<compile_context>
chip_gen: v7x
topology: tpu7x:2x2x1
jax: 0.10.0
libtpu: 0.0.40
codegen_flags: <defaults>
</compile_context>

<pallas_src>
import functools
import math

import jax
import jax.numpy as jnp
from jax import lax
from jax.experimental import pallas as pl
from jax.experimental.pallas import tpu as pltpu

# Module "hyper-parameters" (the PyTorch defaults gamma=0, alpha=None would crash the
# reference forward, so we use standard focal-loss settings).
GAMMA = 2.0
ALPHA = 0.25

_LANE = 128
_ROW_GRANULE = 16            # rows per granule -> m_rows is a multiple of 16 (bf16 packing)
_MAX_TILE_ROWS = 8192        # (8192,128): 4 MiB f32 + 2 MiB bf16 per grid step
_CHUNK_ROWS = 1024           # inner-loop chunk: elementwise temps stay ~0.5 MiB
_NUM_PARTIALS = 2            # leading 'parallel' axis -> both TensorCores on v7x
_VMEM_LIMIT = 32 * 1024 * 1024


def _focal_loss_kernel(x_ref, t_ref, o_ref, *, gamma, alpha, m_rows,
                       tile_rows, tiles_per_core, full_tiles, chunk_rows):
    """Accumulates sum((1-pt)^gamma * alpha_t * log(pt))  (NOT yet negated) for this
    partial's row tiles into a resident (8,128) f32 output block."""
    c = pl.program_id(0)     # partial / core index            ("parallel")
    i = pl.program_id(1)     # row-tile index within partial   ("arbitrary")

    @pl.when(i == 0)
    def _init():
        o_ref[...] = jnp.zeros_like(o_ref)

    n_chunks = tile_rows // chunk_rows

    def chunk_sum(x, t, row0, valid_rows):
        """(rows,128) chunk -> (8,128) partial sum with pure VPU adds."""
        x = x.astype(jnp.float32)
        t = t.astype(jnp.float32)
        one_m_t = 1.0 - t
        pt = x * t + (1.0 - x) * one_m_t
        # alpha*t + (1-alpha)*(1-t) folded into a single mul+add.
        at = (2.0 * alpha - 1.0) * t + (1.0 - alpha)
        focal = (1.0 - pt) ** gamma          # int gamma -> integer_pow (VPU-only)
        val = focal * (jnp.log(pt) * at)     # sign applied once in the wrapper
        if valid_rows is not None:
            # Select (not multiply): kills NaN/Inf from log() of ragged-padding garbage.
            row = row0 + lax.broadcasted_iota(jnp.int32, val.shape, 0)
            val = jnp.where(row < valid_rows, val, 0.0)
        rows = val.shape[0]
        return jnp.sum(val.reshape(rows // 8, 8, _LANE), axis=0)

    def tile_partial_sum(valid_rows):
        # valid_rows=None -> interior tile: no mask code is traced at all.
        if n_chunks == 1:
            return chunk_sum(x_ref[...], t_ref[...], 0, valid_rows)

        def body(k, acc):
            r0 = pl.multiple_of(k * chunk_rows, chunk_rows)
            return acc + chunk_sum(x_ref[pl.ds(r0, chunk_rows), :],
                                   t_ref[pl.ds(r0, chunk_rows), :],
                                   r0, valid_rows)

        return lax.fori_loop(0, n_chunks, body, jnp.zeros((8, _LANE), jnp.float32))

    tile_idx = c * tiles_per_core + i

    @pl.when(tile_idx < full_tiles)      # interior tiles: every row valid, unmasked fast path
    def _interior():
        o_ref[...] += tile_partial_sum(None)

    @pl.when(tile_idx >= full_tiles)     # ragged last tile and clamped duplicate tiles
    def _edge():
        valid_rows = m_rows - tile_idx * tile_rows   # <= 0 for duplicates -> fully masked
        o_ref[...] += tile_partial_sum(valid_rows)


def _focal_terms(x, t, gamma, alpha):
    """Per-element (1-pt)^gamma * alpha_t * log(pt); loss = -mean of this."""
    x = x.astype(jnp.float32)
    t = t.astype(jnp.float32)
    pt = x * t + (1.0 - x) * (1.0 - t)
    at = alpha * t + (1.0 - alpha) * (1.0 - t)
    return ((1.0 - pt) ** gamma) * (jnp.log(pt) * at)


def binary_focal_loss(inp, target, gamma=GAMMA, alpha=ALPHA, target_bf16=True):
    """JAX/Pallas equivalent of BinaryFocalLoss.forward (size_average=True).

    target_bf16: ship the target as bf16 (exact for hard {0,1} labels, ~25% less HBM
    traffic). Pass False if soft labels must stay bit-exact in f32.
    """
    # --- replicate the PyTorch pairing semantics (without transposing the f32 input) ----
    if inp.ndim == 1:
        inp = inp[:, None]
    if target.ndim == 1:
        target = target[:, None]

    t_dtype = jnp.bfloat16 if target_bf16 else jnp.float32

    if inp.ndim > 2:
        n, ch = inp.shape[0], inp.shape[1]
        spatial = inp.size // (n * ch)
        # PyTorch pairs input.view(N,C,HW).transpose(1,2).reshape(-1,C) with a (N*HW, C)
        # target. The mean is order-invariant as long as the pairing is preserved, so the
        # big f32 input keeps its native NCHW layout and the small bf16 target is
        # transposed into NCHW order instead.
        tgt = jnp.broadcast_to(target, (n * spatial, ch)).astype(t_dtype)
        tgt = jnp.transpose(tgt.reshape(n, spatial, ch), (0, 2, 1))   # == NCHW order
        x_pair, t_pair = inp, tgt
    else:
        x_pair = inp
        t_pair = jnp.broadcast_to(target, inp.shape).astype(t_dtype)

    count = x_pair.size                      # true element count for the mean

    # --- lane-dense flattened view; no jnp.pad full-array copy --------------------------
    x_flat = x_pair.reshape(-1)              # view of the contiguous input
    t_flat = t_pair.reshape(-1)
    granule = _ROW_GRANULE * _LANE           # 2048 elements -> m_rows multiple of 16
    main = (count // granule) * granule
    tail = count - main                      # < 2048 elements -> plain-JAX sum below

    # Integer gamma -> integer_pow (VPU multiplies) instead of exp/log pow on the EUP.
    gamma = int(gamma) if float(gamma).is_integer() else float(gamma)
    alpha = float(alpha)

    kernel_sum = jnp.float32(0.0)
    if main:
        m_rows = main // _LANE
        x2 = x_flat[:main].reshape(m_rows, _LANE)   # no-op slice when count is aligned
        t2 = t_flat[:main].reshape(m_rows, _LANE)

        tile_rows = min(_MAX_TILE_ROWS, m_rows)     # both are multiples of 16
        chunk_rows = math.gcd(tile_rows, _CHUNK_ROWS)
        num_row_tiles = pl.cdiv(m_rows, tile_rows)
        full_tiles = m_rows // tile_rows            # tiles with no ragged rows
        num_partials = min(_NUM_PARTIALS, num_row_tiles)
        tiles_per_core = pl.cdiv(num_row_tiles, num_partials)

        kernel = functools.partial(
            _focal_loss_kernel, gamma=gamma, alpha=alpha, m_rows=m_rows,
            tile_rows=tile_rows, tiles_per_core=tiles_per_core,
            full_tiles=full_tiles, chunk_rows=chunk_rows)

        def in_map(c, i):
            # Clamp so the DMA never starts fully out of bounds; the edge branch masks
            # any contribution from clamped / ragged tiles.
            return (jnp.minimum(c * tiles_per_core + i, num_row_tiles - 1), 0)

        partials = pl.pallas_call(
            kernel,
            out_shape=jax.ShapeDtypeStruct((num_partials * 8, _LANE), jnp.float32),
            grid_spec=pltpu.PrefetchScalarGridSpec(
                num_scalar_prefetch=0,
                grid=(num_partials, tiles_per_core),
                in_specs=[
                    pl.BlockSpec((tile_rows, _LANE), in_map),
                    pl.BlockSpec((tile_rows, _LANE), in_map),
                ],
                out_specs=pl.BlockSpec((8, _LANE), lambda c, i: (c, 0)),
            ),
            compiler_params=pltpu.CompilerParams(
                dimension_semantics=("parallel", "arbitrary"),
                vmem_limit_bytes=_VMEM_LIMIT,
            ),
        )(x2, t2)
        kernel_sum = jnp.sum(partials)   # one cross-lane reduce, outside the hot loop

    tail_sum = jnp.float32(0.0)
    if tail:
        tail_sum = jnp.sum(_focal_terms(x_flat[main:], t_flat[main:], gamma, alpha))

    # Single negate + divide for the mean (sign hoisted out of the per-element kernel).
    return -(kernel_sum + tail_sum) / jnp.float32(count)


def _reference(inp, target, gamma=GAMMA, alpha=ALPHA):
    """Pure-JAX reference matching the PyTorch forward."""
    if inp.ndim == 1:
        inp = inp[:, None]
    if target.ndim == 1:
        target = target[:, None]
    if inp.ndim > 2:
        n, c = inp.shape[0], inp.shape[1]
        inp = jnp.transpose(inp.reshape(n, c, -1), (0, 2, 1)).reshape(-1, c)
    pt = inp * target + (1 - inp) * (1 - target)
    logpt = jnp.log(pt)
    at = alpha * target + (1 - alpha) * (1 - target)
    logpt = logpt * at
    loss = -1 * (1 - pt) ** gamma * logpt
    return loss.mean()


if __name__ == "__main__":
    key = jax.random.PRNGKey(0)
    k1, k2, k3, k4, k5, k6 = jax.random.split(key, 6)

    # Case 1: NCHW probabilities + (N*H*W, C) hard labels (granule-aligned element count).
    N, C, H, W = 2, 4, 16, 16
    x = jax.nn.sigmoid(jax.random.normal(k1, (N, C, H, W), dtype=jnp.float32))
    t = (jax.random.uniform(k2, (N * H * W, C)) > 0.5).astype(jnp.float32)
    loss = jax.block_until_ready(binary_focal_loss(x, t))
    ref = _reference(x, t)
    assert jnp.allclose(loss, ref, rtol=1e-5, atol=1e-6), (loss, ref)

    # Case 2: element count not a multiple of the (16,128) granule -> kernel + JAX tail path.
    N2, C2, H2, W2 = 2, 4, 24, 24
    x2 = jax.nn.sigmoid(jax.random.normal(k3, (N2, C2, H2, W2), dtype=jnp.float32))
    t2 = (jax.random.uniform(k4, (N2 * H2 * W2, C2)) > 0.5).astype(jnp.float32)
    loss2 = jax.block_until_ready(binary_focal_loss(x2, t2))
    ref2 = _reference(x2, t2)
    assert jnp.allclose(loss2, ref2, rtol=1e-5, atol=1e-6), (loss2, ref2)

    # Case 3: large enough to exercise multi-tile grid, both megacore partials, the
    # chunked fori_loop body, and the masked ragged-edge tile.
    N3, C3, H3, W3 = 4, 4, 320, 256
    x3 = jax.nn.sigmoid(jax.random.normal(k5, (N3, C3, H3, W3), dtype=jnp.float32))
    t3 = (jax.random.uniform(k6, (N3 * H3 * W3, C3)) > 0.5).astype(jnp.float32)
    loss3 = jax.block_until_ready(binary_focal_loss(x3, t3))
    ref3 = _reference(x3, t3)
    assert jnp.allclose(loss3, ref3, rtol=2e-5, atol=1e-6), (loss3, ref3)

    print("KERNEL_OK")
</pallas_src>

<mosaic_0001>
module attributes {stable_mosaic.version = 11 : i64} {
  func.func @_focal_loss_kernel(%arg0: i32, %arg1: i32, %arg2: memref<16x128xf32, #tpu.memory_space<vmem>>, %arg3: memref<16x128xbf16, #tpu.memory_space<vmem>>, %arg4: memref<8x128xf32, #tpu.memory_space<vmem>>) attributes {dimension_semantics = [#tpu.dimension_semantics<parallel>, #tpu.dimension_semantics<arbitrary>], iteration_bounds = array<i64: 1, 1>, scalar_prefetch = 0 : i64, scratch_operands = 0 : i64, tpu.core_type = #tpu.core_type<tc>, window_params = [{transform_indices = @transform_0, window_bounds = array<i64: 16, 128>}, {transform_indices = @transform_1, window_bounds = array<i64: 16, 128>}, {transform_indices = @transform_2, window_bounds = array<i64: 8, 128>}]} {
    %c0_i32 = arith.constant 0 : i32
    %0 = arith.cmpi eq, %arg1, %c0_i32 : i32
    %1 = arith.extui %0 : i1 to i32
    %c0_i32_0 = arith.constant 0 : i32
    %2 = arith.cmpi ne, %1, %c0_i32_0 : i32
    scf.if %2 {
      %cst = arith.constant 0.000000e+00 : f32
      %11 = vector.broadcast %cst : f32 to vector<8x128xf32>
      %c0 = arith.constant 0 : index
      %c0_5 = arith.constant 0 : index
      %12 = vector.load %arg4[%c0, %c0_5] : memref<8x128xf32, #tpu.memory_space<vmem>>, vector<8x128xf32>
      tpu.vector_store %arg4[%c0, %c0_5], %11 {strides = array<i32>} : memref<8x128xf32, #tpu.memory_space<vmem>>, vector<8x128xf32>,
    } else {
    }
    %c1_i32 = arith.constant 1 : i32
    %3 = arith.muli %arg0, %c1_i32 : i32
    %4 = arith.addi %3, %arg1 : i32
    %c1_i32_1 = arith.constant 1 : i32
    %5 = arith.cmpi slt, %4, %c1_i32_1 : i32
    %6 = arith.extui %5 : i1 to i32
    %c0_i32_2 = arith.constant 0 : i32
    %7 = arith.cmpi ne, %6, %c0_i32_2 : i32
    scf.if %7 {
      %c0 = arith.constant 0 : index
      %c0_5 = arith.constant 0 : index
      %11 = vector.load %arg4[%c0, %c0_5] : memref<8x128xf32, #tpu.memory_space<vmem>>, vector<8x128xf32>
      %c0_6 = arith.constant 0 : index
      %c0_7 = arith.constant 0 : index
      %12 = vector.load %arg2[%c0_6, %c0_7] : memref<16x128xf32, #tpu.memory_space<vmem>>, vector<16x128xf32>
      %c0_8 = arith.constant 0 : index
      %c0_9 = arith.constant 0 : index
      %13 = vector.load %arg3[%c0_8, %c0_9] : memref<16x128xbf16, #tpu.memory_space<vmem>>, vector<16x128xbf16>
      %14 = arith.extf %13 : vector<16x128xbf16> to vector<16x128xf32>
      %cst = arith.constant 1.000000e+00 : f32
      %15 = vector.broadcast %cst : f32 to vector<16x128xf32>
      %16 = arith.subf %15, %14 : vector<16x128xf32>
      %17 = arith.mulf %12, %14 : vector<16x128xf32>
      %cst_10 = arith.constant 1.000000e+00 : f32
      %18 = vector.broadcast %cst_10 : f32 to vector<16x128xf32>
      %19 = arith.subf %18, %12 : vector<16x128xf32>
      %20 = arith.mulf %19, %16 : vector<16x128xf32>
      %21 = arith.addf %17, %20 : vector<16x128xf32>
      %cst_11 = arith.constant -5.000000e-01 : f32
      %22 = vector.broadcast %cst_11 : f32 to vector<16x128xf32>
      %23 = arith.mulf %22, %14 : vector<16x128xf32>
      %cst_12 = arith.constant 7.500000e-01 : f32
      %24 = vector.broadcast %cst_12 : f32 to vector<16x128xf32>
      %25 = arith.addf %23, %24 : vector<16x128xf32>
      %cst_13 = arith.constant 1.000000e+00 : f32
      %26 = vector.broadcast %cst_13 : f32 to vector<16x128xf32>
      %27 = arith.subf %26, %21 : vector<16x128xf32>
      %28 = arith.mulf %27, %27 : vector<16x128xf32>
      %29 = math.log %21 : vector<16x128xf32>
      %30 = arith.mulf %29, %25 : vector<16x128xf32>
      %31 = arith.mulf %28, %30 : vector<16x128xf32>
      %32 = vector.shape_cast %31 : vector<16x128xf32> to vector<2x8x128xf32>
      %cst_14 = arith.constant dense<0.000000e+00> : vector<8x128xf32>
      %33 = vector.multi_reduction <add>, %32, %cst_14 [0] : vector<2x8x128xf32> to vector<8x128xf32>
      %34 = arith.addf %11, %33 : vector<8x128xf32>
      %c0_15 = arith.constant 0 : index
      %c0_16 = arith.constant 0 : index
      %35 = vector.load %arg4[%c0_15, %c0_16] : memref<8x128xf32, #tpu.memory_space<vmem>>, vector<8x128xf32>
      tpu.vector_store %arg4[%c0_15, %c0_16], %34 {strides = array<i32>} : memref<8x128xf32, #tpu.memory_space<vmem>>, vector<8x128xf32>,
    } else {
    }
    %c1_i32_3 = arith.constant 1 : i32
    %8 = arith.cmpi sge, %4, %c1_i32_3 : i32
    %9 = arith.extui %8 : i1 to i32
    %c0_i32_4 = arith.constant 0 : i32
    %10 = arith.cmpi ne, %9, %c0_i32_4 : i32
    scf.if %10 {
      %c16_i32 = arith.constant 16 : i32
      %11 = arith.muli %4, %c16_i32 : i32
      %c16_i32_5 = arith.constant 16 : i32
      %12 = arith.subi %c16_i32_5, %11 : i32
      %c0 = arith.constant 0 : index
      %c0_6 = arith.constant 0 : index
      %13 = vector.load %arg4[%c0, %c0_6] : memref<8x128xf32, #tpu.memory_space<vmem>>, vector<8x128xf32>
      %c0_7 = arith.constant 0 : index
      %c0_8 = arith.constant 0 : index
      %14 = vector.load %arg2[%c0_7, %c0_8] : memref<16x128xf32, #tpu.memory_space<vmem>>, vector<16x128xf32>
      %c0_9 = arith.constant 0 : index
      %c0_10 = arith.constant 0 : index
      %15 = vector.load %arg3[%c0_9, %c0_10] : memref<16x128xbf16, #tpu.memory_space<vmem>>, vector<16x128xbf16>
      %16 = arith.extf %15 : vector<16x128xbf16> to vector<16x128xf32>
      %cst = arith.constant 1.000000e+00 : f32
      %17 = vector.broadcast %cst : f32 to vector<16x128xf32>
      %18 = arith.subf %17, %16 : vector<16x128xf32>
      %19 = arith.mulf %14, %16 : vector<16x128xf32>
      %cst_11 = arith.constant 1.000000e+00 : f32
      %20 = vector.broadcast %cst_11 : f32 to vector<16x128xf32>
      %21 = arith.subf %20, %14 : vector<16x128xf32>
      %22 = arith.mulf %21, %18 : vector<16x128xf32>
      %23 = arith.addf %19, %22 : vector<16x128xf32>
      %cst_12 = arith.constant -5.000000e-01 : f32
      %24 = vector.broadcast %cst_12 : f32 to vector<16x128xf32>
      %25 = arith.mulf %24, %16 : vector<16x128xf32>
      %cst_13 = arith.constant 7.500000e-01 : f32
      %26 = vector.broadcast %cst_13 : f32 to vector<16x128xf32>
      %27 = arith.addf %25, %26 : vector<16x128xf32>
      %cst_14 = arith.constant 1.000000e+00 : f32
      %28 = vector.broadcast %cst_14 : f32 to vector<16x128xf32>
      %29 = arith.subf %28, %23 : vector<16x128xf32>
      %30 = arith.mulf %29, %29 : vector<16x128xf32>
      %31 = math.log %23 : vector<16x128xf32>
      %32 = arith.mulf %31, %27 : vector<16x128xf32>
      %33 = arith.mulf %30, %32 : vector<16x128xf32>
      %34 = tpu.iota {dimensions = array<i32: 0>} : vector<16x128xi32>
      %c0_i32_15 = arith.constant 0 : i32
      %35 = vector.broadcast %c0_i32_15 : i32 to vector<16x128xi32>
      %36 = arith.addi %35, %34 : vector<16x128xi32>
      %37 = vector.broadcast %12 : i32 to vector<16x128xi32>
      %38 = arith.cmpi slt, %36, %37 : vector<16x128xi32>
      %cst_16 = arith.constant 0.000000e+00 : f32
      %39 = vector.broadcast %cst_16 : f32 to vector<16x128xf32>
      %40 = arith.select %38, %33, %39 : vector<16x128xi1>, vector<16x128xf32>
      %41 = vector.shape_cast %40 : vector<16x128xf32> to vector<2x8x128xf32>
      %cst_17 = arith.constant dense<0.000000e+00> : vector<8x128xf32>
      %42 = vector.multi_reduction <add>, %41, %cst_17 [0] : vector<2x8x128xf32> to vector<8x128xf32>
      %43 = arith.addf %13, %42 : vector<8x128xf32>
      %c0_18 = arith.constant 0 : index
      %c0_19 = arith.constant 0 : index
      %44 = vector.load %arg4[%c0_18, %c0_19] : memref<8x128xf32, #tpu.memory_space<vmem>>, vector<8x128xf32>
      tpu.vector_store %arg4[%c0_18, %c0_19], %43 {strides = array<i32>} : memref<8x128xf32, #tpu.memory_space<vmem>>, vector<8x128xf32>,
    } else {
    }
    return
  }
  func.func @transform_0(%arg0: i32, %arg1: i32) -> (i32, i32) {
    %c1_i32 = arith.constant 1 : i32
    %0 = arith.muli %arg0, %c1_i32 : i32
    %1 = arith.addi %0, %arg1 : i32
    %c0_i32 = arith.constant 0 : i32
    %2 = arith.minsi %1, %c0_i32 : i32
    %c0_i32_0 = arith.constant 0 : i32
    %c0_i32_1 = arith.constant 0 : i32
    return %2, %c0_i32_0 : i32, i32
  }
  func.func @transform_1(%arg0: i32, %arg1: i32) -> (i32, i32) {
    %c1_i32 = arith.constant 1 : i32
    %0 = arith.muli %arg0, %c1_i32 : i32
    %1 = arith.addi %0, %arg1 : i32
    %c0_i32 = arith.constant 0 : i32
    %2 = arith.minsi %1, %c0_i32 : i32
    %c0_i32_0 = arith.constant 0 : i32
    %c0_i32_1 = arith.constant 0 : i32
    return %2, %c0_i32_0 : i32, i32
  }
  func.func @transform_2(%arg0: i32, %arg1: i32) -> (i32, i32) {
    %c0_i32 = arith.constant 0 : i32
    %c0_i32_0 = arith.constant 0 : i32
    return %arg0, %c0_i32 : i32, i32
  }
}

</mosaic_0001>

<bundles_post_ra>
// kernel: tpu_custom_call.1
= control target key start
LH: loop header
LB: loop body
LE: loop exit
PB: predicated region body
PF: predicated region fallthrough
CT: control target
= control target key end

     0   :  { %7 = vsyncpa [#allocation3], 0  ;;  %s322_s0 = inlined_call_operand.hbm [shape: f32[16,128], index: 0, kind: input, shape index: {}]   ;;  %s323_s1 = inlined_call_operand.hbm [shape: bf16[16,128], index: 1, kind: input, shape index: {}]   ;;  %s324_s2 = inlined_call_operand.hbm [shape: f32[8,128], index: 2, kind: output, shape index: {}]  }
   0x1   :  { %8 = vsyncpa [#allocation6], 0 }
   0x2   :  { %9 = vsyncpa [#allocation4], 0  ;;  %s264_s9 = smov [#allocation2]   ;;  %s192_s13 = scalar_lea.hbm %s322_s0, 256 }
   0x3   :  { %s21_s10 = sshll.u32 %s264_s9, 4  ;;  %p193_p0 = scmp.ne.s32.totalorder %s322_s0, %s192_s13  ;;  %s22_s10 = int_to_ptr.vmem [resolvable:$true] %s21_s10 }
   0x4   :  { %p196_p1 = scmp.lt.u32.totalorder %s192_s13, %s322_s0 }
   0x6   :  { %p198_p2 = pnand %p196_p1, %p193_p0 }
   0x8   :  { %201 = shalt.err (!%p198_p2)
}
   0x9   :  { %s202_s18 = scalar_lea.vmem %s22_s10, 256  ;;  %p207_p4 = scmp.lt.s32.totalorder %s22_s10, %s22_s10 }
   0xa   :  { %p203_p3 = scmp.ne.s32.totalorder %s22_s10, %s202_s18  ;;  %p208_p5 = scmp.lt.s32.totalorder %s202_s18, %s202_s18 }
   0xc   :  { %p209_p6 = por %p208_p5, %p207_p4 }
   0xe   :  { %p210_p7 = pnand %p209_p6, %p203_p3 }
  0x10   :  { %213 = shalt.err (!%p210_p7)
}
  0x11   :  { %s265_s19 = smov 128   ;;  %s266_s20 = smov 8  }
  0x12   :  { %27 = dma.hbm_to_vmem [thread:$0]  %s322_s0, 256, %s22_s10, [#allocation3], %s265_s19, %s265_s19, %s266_s20  }
  0x13   :  { %s267_s23 = smov [#allocation5]   ;;  %s214_s27 = scalar_lea.hbm %s323_s1, 128 }
  0x14   :  { %s39_s24 = sshll.u32 %s267_s23, 4  ;;  %p215_p8 = scmp.ne.s32.totalorder %s323_s1, %s214_s27  ;;  %s40_s24 = int_to_ptr.vmem [resolvable:$true] %s39_s24 }
  0x15   :  { %p218_p9 = scmp.lt.u32.totalorder %s214_s27, %s323_s1 }
  0x17   :  { %p220_p10 = pnand %p218_p9, %p215_p8 }
  0x19   :  { %223 = shalt.err (!%p220_p10)
}
  0x1a   :  { %s224_s4 = scalar_lea.vmem %s40_s24, 128  ;;  %p229_p12 = scmp.lt.s32.totalorder %s40_s24, %s40_s24 }
  0x1b   :  { %p225_p11 = scmp.ne.s32.totalorder %s40_s24, %s224_s4  ;;  %p230_p13 = scmp.lt.s32.totalorder %s224_s4, %s224_s4 }
  0x1d   :  { %p231_p0 = por %p230_p13, %p229_p12 }
  0x1f   :  { %p232_p1 = pnand %p231_p0, %p225_p11 }
  0x21   :  { %235 = shalt.err (!%p232_p1)
}
  0x22   :  { %s268_s0 = smov 64   ;;  %s269_s5 = smov 4  }
  0x23   :  { %45 = dma.hbm_to_vmem [thread:$0]  %s323_s1, 128, %s40_s24, [#allocation6], %s268_s0, %s268_s0, %s269_s5  }
  0x24   :  { %258 = dma.done.wait [#allocation3], 256  }
  0x25   :  { %259 = vsyncadd [#allocation3], 4294967040 }
  0x26   :  { %260 = dma.done.wait [#allocation6], 128  }
  0x27   :  { %261 = vsyncadd [#allocation6], 4294967168  ;;  %v71_v0 = vld [vmem:[#allocation2] sm:$0xff]  ;;  %v72_v1 = vld [vmem:[#allocation2 + $0x8] sm:$0xff]  ;;  %s270_s1 = smov [#allocation7]  }
  0x28   :  { %v177_v2 = vld [vmem:[#allocation5] sm:$0xff]   ;;  %v81_v5 = vsub.f32 1.0, %v71_v0  ;;  %v82_v6 = vsub.f32 1.0, %v72_v1  ;;  %s162_s8 = sshll.u32 %s270_s1, 4  ;;  %s163_s8 = int_to_ptr.vmem [resolvable:$true] %s162_s8 }
  0x29   :  { %v178_v3 = vunpack.c.l.bf16 %v177_v2  ;;  %v179_v4 = vunpack.c.h.bf16 %v177_v2  ;;  %s236_s9 = scalar_lea.vmem %s163_s8, 128  ;;  %p241_p3 = scmp.lt.s32.totalorder %s163_s8, %s163_s8 }
  0x2a   :  { %p237_p2 = scmp.ne.s32.totalorder %s163_s8, %s236_s9  ;;  %p242_p4 = scmp.lt.s32.totalorder %s236_s9, %s236_s9 }
  0x2b   :  { %v77_v7 = vsub.f32 1.0, %v178_v3  ;;  %v78_v8 = vsub.f32 1.0, %v179_v4  ;;  %v79_v9 = vmul.f32 %v178_v3, %v71_v0  ;;  %v80_v10 = vmul.f32 %v179_v4, %v72_v1 }
  0x2c   :  { %v87_v15 = vmul.f32 -0.5, %v178_v3  ;;  %v88_v16 = vmul.f32 -0.5, %v179_v4  ;;  %p243_p5 = por %p242_p4, %p241_p3 }
  0x2d   :  { %v83_v11 = vmul.f32 %v81_v5, %v77_v7  ;;  %v84_v12 = vmul.f32 %v82_v6, %v78_v8 }
  0x2e   :  { %v89_v19 = vadd.f32 0.75, %v87_v15  ;;  %v90_v21 = vadd.f32 0.75, %v88_v16  ;;  %p244_p6 = pnand %p243_p5, %p237_p2 }
  0x2f   :  { %v85_v13 = vadd.f32 %v83_v11, %v79_v9  ;;  %v86_v14 = vadd.f32 %v84_v12, %v80_v10 }
  0x31   :  { %188 = vlog2.f32 %v85_v13  ;;  %v91_v17 = vsub.f32 1.0, %v85_v13  ;;  %v92_v18 = vsub.f32 1.0, %v86_v14 }
  0x32   :  { %190 = vlog2.f32 %v86_v14 }
  0x33   :  { %v93_v23 = vmul.f32 %v91_v17, %v91_v17  ;;  %v94_v25 = vmul.f32 %v92_v18, %v92_v18 }
  0x3b   :  { %v189_v20 = vpop.eup %188 }
  0x3c   :  { %v191_v22 = vpop.eup %190  ;;  %v96_v24 = vmul.f32 0.6931472, %v189_v20 }
  0x3d   :  { %v98_v26 = vmul.f32 0.6931472, %v191_v22 }
  0x3e   :  { %v99_v27 = vmul.f32 %v96_v24, %v89_v19 }
  0x3f   :  { %v100_v28 = vmul.f32 %v98_v26, %v90_v21 }
  0x40   :  { %v101_v29 = vmul.f32 %v99_v27, %v93_v23 }
  0x41   :  { %v102_v30 = vmul.f32 %v100_v28, %v94_v25 }
  0x43   :  { %v103_v31 = vadd.f32 %v102_v30, %v101_v29 }
  0x45   :  { %105 = vst [vmem:[#allocation7] sm:$0xff] %v103_v31 }
  0x46   :  { %247 = shalt.err (!%p244_p6)
}
  0x47   :  { %s248_s12 = scalar_lea.hbm %s324_s2, 128 }
  0x48   :  { %p249_p7 = scmp.ne.s32.totalorder %s324_s2, %s248_s12  ;;  %p252_p8 = scmp.lt.u32.totalorder %s248_s12, %s324_s2 }
  0x4a   :  { %p254_p9 = pnand %p252_p8, %p249_p7 }
  0x4c   :  { %257 = shalt.err (!%p254_p9)
}
  0x4d   :  { %165 = dma.vmem_to_hbm [thread:$0]  %s163_s8, 128, %s324_s2, [#allocation4]  }
  0x4e   :  { %262 = dma.done.wait [#allocation4], 128  }
  0x4f   :  { %263 = vsyncadd [#allocation4], 4294967168 }
  0x50   :  { %169 = vsyncpa [#allocation3], 1 }
  0x51   :  { %170 = vsyncpa [#allocation6], 1 }
  0x52   :  { %171 = vsyncpa [#allocation4], 1 }

</bundles_post_ra>
